<compile_context>
chip_gen: v7x
topology: tpu7x:2x2x1
jax: 0.10.0
libtpu: 0.0.40
codegen_flags: <defaults>
</compile_context>

<pallas_src>
import math

import jax
import jax.numpy as jnp
from jax.experimental import pallas as pl
from jax.experimental.pallas import tpu as pltpu


def _cdiv(a: int, b: int) -> int:
    return -(-a // b)


def _add_pe_kernel(x_ref, pe_ref, o_ref):
    # x_ref / o_ref: (TB, TR, L) block; pe_ref: (TR, L) block, float32.
    # Add in f32 (free VPU casts), store back in the output dtype.
    x = x_ref[...].astype(jnp.float32)
    o_ref[...] = (x + pe_ref[...][None, :, :]).astype(o_ref.dtype)


def make_positional_encoding_table(d_model: int, max_len: int = 5000) -> jnp.ndarray:
    """Deterministic sinusoidal table, shape [max_len, d_model] (float32)."""
    # Same limitation as the PyTorch reference: odd d_model would shape-mismatch.
    assert d_model % 2 == 0, "sinusoidal PE requires an even d_model"
    position = jnp.arange(max_len, dtype=jnp.float32)[:, None]                 # [L, 1]
    div_term = jnp.exp(
        jnp.arange(0, d_model, 2, dtype=jnp.float32) * (-math.log(10000.0) / d_model)
    )                                                                           # [D/2]
    angles = position * div_term                                                # [L, D/2]
    pe = jnp.zeros((max_len, d_model), dtype=jnp.float32)
    pe = pe.at[:, 0::2].set(jnp.sin(angles))
    pe = pe.at[:, 1::2].set(jnp.cos(angles))
    return pe


def _choose_tiles(B: int, R: int, L: int, itemsize: int, target_bytes: int):
    """Pick (TB, TR): batch rows folded into the block + sublane-aligned row tile.

    Budget: x block + out block (x dtype) + pe block (f32) together stay near
    3 * target_bytes, so double-buffered VMEM use is <= ~6 * target_bytes
    (~12 MiB at the 2 MiB default — safe on v5e/v6e/v7x scoped defaults).
    """
    if R < 8:
        return B, R                      # too few rows to sublane-tile; full extent
    sub = 8                              # sublane alignment for the row dim
    budget = 3 * target_bytes
    # Fold as much of the batch as fits next to a minimal 8-row tile.
    TB = int(min(B, max(1, budget // (sub * 2 * itemsize * L))))
    # Rows per block from the exact per-row cost (x + out in x dtype, pe in f32).
    row_cost = (2 * TB * itemsize + 4) * L
    max_tr = R if R % sub == 0 else (R // sub) * sub
    TR = int(min(max_tr, max(sub, (budget // max(1, row_cost)) // sub * sub)))
    # Keep >= 2 grid steps so both v7x TensorCores get work ("parallel" axes);
    # harmless extra step on 1-TC v5e/v6e.
    if _cdiv(B, TB) * _cdiv(R, TR) < 2 and R >= 2 * sub:
        TR = int(min(max_tr, _cdiv(_cdiv(R, 2), sub) * sub))
    return TB, TR


def _tiled_add(x3: jnp.ndarray, pe2: jnp.ndarray, *, target_block_bytes: int,
               donate_x: bool) -> jnp.ndarray:
    """x3: [B, R, L]; pe2: [>=R, L] float32. Returns x3 + pe2[:R][None]."""
    B, R, L = x3.shape
    itemsize = jnp.dtype(x3.dtype).itemsize
    TB, TR = _choose_tiles(B, R, L, itemsize, target_block_bytes)
    if TR % 8 != 0 and pe2.shape[0] != R:
        # Full-extent row block with R % 8 != 0 is only legal on the pe array
        # if its leading dim equals R too; slice the (tiny) table in that case.
        pe2 = pe2[:R]
    n_r = _cdiv(R, TR)
    n_b = _cdiv(B, TB)

    return pl.pallas_call(
        _add_pe_kernel,
        out_shape=jax.ShapeDtypeStruct((B, R, L), x3.dtype),
        grid_spec=pltpu.PrefetchScalarGridSpec(
            num_scalar_prefetch=0,
            # Row tiles outer, batch chunks inner: the pe block index depends
            # only on the outer axis, so pe stays resident across the inner
            # loop (usually n_b == 1 anyway since the batch is folded into TB).
            grid=(n_r, n_b),
            in_specs=[
                pl.BlockSpec((TB, TR, L), lambda r, b: (b, r, 0)),
                pl.BlockSpec((TR, L), lambda r, b: (r, 0)),
            ],
            out_specs=pl.BlockSpec((TB, TR, L), lambda r, b: (b, r, 0)),
        ),
        # Only alias when the caller actually donates x; otherwise XLA would
        # insert a defensive copy and negate the benefit.
        input_output_aliases=({0: 0} if donate_x else {}),
        compiler_params=pltpu.CompilerParams(
            dimension_semantics=("parallel", "parallel"),
        ),
    )(x3, pe2)


def positional_encoding_forward(x: jnp.ndarray, pe_table: jnp.ndarray, *,
                                target_block_bytes: int = 2 << 20,
                                min_pallas_bytes: int = 1 << 20,
                                donate_x: bool = False) -> jnp.ndarray:
    """x: [B, S, D]; pe_table: [max_len, D] (f32). Returns x + pe[:S] (batch-broadcast)."""
    assert x.ndim == 3
    B, S, D = x.shape
    max_len, d_model = pe_table.shape
    assert D == d_model, f"d_model mismatch: x has {D}, table has {d_model}"
    assert S <= max_len, f"seq_len {S} exceeds pe table max_len {max_len}"

    pe_f32 = pe_table.astype(jnp.float32)   # no-op for the f32 table
    total_bytes = x.size * jnp.dtype(x.dtype).itemsize
    if total_bytes < min_pallas_bytes:
        # Tiny payload: fixed pallas_call overhead dominates and a plain
        # broadcast-add can be fused by XLA into neighbouring ops.
        return (x.astype(jnp.float32) + pe_f32[:S][None]).astype(x.dtype)

    if D % 128 == 0:
        # Lane dimension already dense (foldingdiff's d_model=384). Pass the
        # full table; the pe BlockSpec windows the first S rows — no wrapper
        # slice/cast, no extra HBM round-trip.
        return _tiled_add(x, pe_f32, target_block_bytes=target_block_bytes,
                          donate_x=donate_x)
    if (S * D) % 128 == 0:
        # D not a multiple of 128 would lower to masked partial stores.
        # Flatten (S, D) -> (R, 128) so every store is a full lane write; the
        # per-batch broadcast of pe is preserved by the matching reshape
        # (row-major merge/split, layout-preserving).
        R = (S * D) // 128
        pe2 = (pe_f32.reshape((max_len * D) // 128, 128)
               if (max_len * D) % 128 == 0 else pe_f32[:S].reshape(R, 128))
        out = _tiled_add(x.reshape(B, R, 128), pe2,
                         target_block_bytes=target_block_bytes, donate_x=donate_x)
        return out.reshape(B, S, D)

    # TODO(synk): pad D to the next multiple of 128 for a lane-dense Pallas
    # path; a masked-partial-store Pallas variant is slower than letting XLA
    # do this add, so fall back to plain JAX for the rare odd-D case.
    return (x.astype(jnp.float32) + pe_f32[:S][None]).astype(x.dtype)


if __name__ == "__main__":
    key = jax.random.PRNGKey(0)

    # Case 1: small demo shape — tiny, handled by the fused-XLA escape hatch.
    B, S, D = 2, 8, 32
    x = jax.random.normal(key, (B, S, D), dtype=jnp.float32)
    pe = make_positional_encoding_table(d_model=D, max_len=5000)
    ref = x + pe[:S][None]
    out = jax.block_until_ready(positional_encoding_forward(x, pe))
    assert out.shape == x.shape
    assert jnp.allclose(out, ref, atol=1e-6), "mismatch (escape-hatch path)"

    # Case 2: foldingdiff-like shape, forced through the Pallas path
    # (D = 384 is a multiple of 128 -> lane-dense blocks, full-table windowing).
    B2, S2, D2 = 2, 128, 384
    x2 = jax.random.normal(jax.random.PRNGKey(1), (B2, S2, D2), dtype=jnp.float32)
    pe2 = make_positional_encoding_table(d_model=D2, max_len=5000)
    ref2 = x2 + pe2[:S2][None]
    out2 = jax.block_until_ready(
        positional_encoding_forward(x2, pe2, min_pallas_bytes=0))
    assert out2.shape == x2.shape
    assert jnp.allclose(out2, ref2, atol=1e-6), "mismatch (D=384 Pallas path)"

    # Case 3: D not a multiple of 128 but S*D is -> flattened lane-dense Pallas path.
    B3, S3, D3 = 2, 16, 64
    x3 = jax.random.normal(jax.random.PRNGKey(2), (B3, S3, D3), dtype=jnp.float32)
    pe3 = make_positional_encoding_table(d_model=D3, max_len=5000)
    ref3 = x3 + pe3[:S3][None]
    out3 = jax.block_until_ready(
        positional_encoding_forward(x3, pe3, min_pallas_bytes=0))
    assert out3.shape == x3.shape
    assert jnp.allclose(out3, ref3, atol=1e-6), "mismatch (flattened Pallas path)"

    # Case 4: bf16 input — in-kernel f32 add then downcast matches the f32 reference.
    x4 = x2.astype(jnp.bfloat16)
    ref4 = (x4.astype(jnp.float32) + pe2[:S2][None]).astype(jnp.bfloat16)
    out4 = jax.block_until_ready(
        positional_encoding_forward(x4, pe2, min_pallas_bytes=0))
    assert out4.shape == x4.shape
    assert jnp.allclose(out4.astype(jnp.float32), ref4.astype(jnp.float32),
                        atol=1e-6), "mismatch (bf16 Pallas path)"

    print("KERNEL_OK")
</pallas_src>

<mosaic_0001>
module attributes {stable_mosaic.version = 11 : i64} {
  func.func @_add_pe_kernel(%arg0: i32, %arg1: i32, %arg2: memref<2x64x384xf32, #tpu.memory_space<vmem>>, %arg3: memref<64x384xf32, #tpu.memory_space<vmem>>, %arg4: memref<2x64x384xf32, #tpu.memory_space<vmem>>) attributes {dimension_semantics = [#tpu.dimension_semantics<parallel>, #tpu.dimension_semantics<parallel>], iteration_bounds = array<i64: 2, 1>, scalar_prefetch = 0 : i64, scratch_operands = 0 : i64, tpu.core_type = #tpu.core_type<tc>, window_params = [{transform_indices = @transform_0, window_bounds = array<i64: 2, 64, 384>}, {transform_indices = @transform_1, window_bounds = array<i64: 64, 384>}, {transform_indices = @transform_2, window_bounds = array<i64: 2, 64, 384>}]} {
    %c0 = arith.constant 0 : index
    %c0_0 = arith.constant 0 : index
    %c0_1 = arith.constant 0 : index
    %0 = vector.load %arg2[%c0, %c0_0, %c0_1] : memref<2x64x384xf32, #tpu.memory_space<vmem>>, vector<2x64x384xf32>
    %c0_2 = arith.constant 0 : index
    %c0_3 = arith.constant 0 : index
    %1 = vector.load %arg3[%c0_2, %c0_3] : memref<64x384xf32, #tpu.memory_space<vmem>>, vector<64x384xf32>
    %2 = vector.shape_cast %1 : vector<64x384xf32> to vector<1x64x384xf32>
    %3 = vector.broadcast %2 : vector<1x64x384xf32> to vector<2x64x384xf32>
    %4 = arith.addf %0, %3 : vector<2x64x384xf32>
    %c0_4 = arith.constant 0 : index
    %c0_5 = arith.constant 0 : index
    %c0_6 = arith.constant 0 : index
    %5 = vector.load %arg4[%c0_4, %c0_5, %c0_6] : memref<2x64x384xf32, #tpu.memory_space<vmem>>, vector<2x64x384xf32>
    tpu.vector_store %arg4[%c0_4, %c0_5, %c0_6], %4 {strides = array<i32>} : memref<2x64x384xf32, #tpu.memory_space<vmem>>, vector<2x64x384xf32>,
    return
  }
  func.func @transform_0(%arg0: i32, %arg1: i32) -> (i32, i32, i32) {
    %c0_i32 = arith.constant 0 : i32
    %c0_i32_0 = arith.constant 0 : i32
    return %arg1, %arg0, %c0_i32 : i32, i32, i32
  }
  func.func @transform_1(%arg0: i32, %arg1: i32) -> (i32, i32) {
    %c0_i32 = arith.constant 0 : i32
    %c0_i32_0 = arith.constant 0 : i32
    return %arg0, %c0_i32 : i32, i32
  }
  func.func @transform_2(%arg0: i32, %arg1: i32) -> (i32, i32, i32) {
    %c0_i32 = arith.constant 0 : i32
    %c0_i32_0 = arith.constant 0 : i32
    return %arg1, %arg0, %c0_i32 : i32, i32, i32
  }
}

</mosaic_0001>

<bundles_post_ra>
// kernel: tpu_custom_call.1
= control target key start
LH: loop header
LB: loop body
LE: loop exit
PB: predicated region body
PF: predicated region fallthrough
CT: control target
= control target key end

     0   :  { %7 = vsyncpa [#allocation3], 0  ;;  %s1220_s0 = inlined_call_operand.hbm [shape: f32[2,128,384], index: 0, kind: input, shape index: {}]   ;;  %s1221_s1 = inlined_call_operand.hbm [shape: f32[5000,384], index: 1, kind: input, shape index: {}]   ;;  %s1222_s2 = inlined_call_operand.hbm [shape: f32[2,128,384], index: 2, kind: output, shape index: {}]  }
   0x1   :  { %9 = vsyncpa [#allocation3 + $0x1], 0 }
   0x2   :  { %10 = vsyncpa [#allocation6], 0 }
   0x3   :  { %12 = vsyncpa [#allocation6 + $0x1], 0 }
   0x4   :  { %13 = vsyncpa [#allocation4], 0 }
   0x5   :  { %15 = vsyncpa [#allocation4 + $0x1], 0  ;;  %s826_s9 = smov 0   ;;  %s828_s10 = smov 0  }
   0x6   :  { %s830_s11 = smov 0   ;;  %s832_s12 = smov 0  }
   0x7   :  { %s834_s13 = smov 0   ;;  %s836_s14 = smov 0  }
   0x8 LB: > { %s590_s15 = sadd.s32 4294967295, %s793_s14   ;;  %s591_s16 = sadd.s32 4294967294, %s793_s14   ;;  %s793_s14 = sphi %s836_s14, %s21_s14   ;;  %s789_s13 = sphi %s834_s13, %s1234_s13   ;;  %s785_s12 = sphi %s832_s12, %s1233_s12   ;;  %s781_s11 = sphi %s830_s11, %s1232_s11   ;;  %s777_s10 = sphi %s828_s10, %s1231_s10   ;;  %s773_s9 = sphi %s826_s9, %s1230_s9  }
   0x9   : > { %s33_s17 = sadd.s32 1, %s789_s13  ;;  %s42_s18 = sadd.s32 1, %s781_s11 }
   0xa   : > { %p35_p0 = scmp.ge.s32.totalorder %s33_s17, 2  ;;  %p49_p1 = scmp.ne.s32.totalorder %s781_s11, %s777_s10 }
   0xb   : > { %p50_p2 = scmp.eq.s32.totalorder %s793_s14, 0  ;;  %p55_p3 = scmp.ne.s32.totalorder %s777_s10, %s773_s9 }
   0xc   : > { %s1236_s17 = smov (%p35_p0, %s33_s17), 0  ;;  %p56_p5 = scmp.eq.s32.totalorder %s590_s15, 0 }
   0xd   : > { %p867_p4 = por %p50_p2, %p49_p1  ;;  %s38_s20 = ssub.s32 %s789_s13, %s1236_s17 }
   0xe   : > { %p107_p6 = scmp.eq.s32.totalorder %s590_s15, 1  ;;  %p40_p7 = scmp.eq.s32.totalorder %s38_s20, 0 }
   0xf   : > { %p873_p8 = por %p56_p5, %p55_p3  ;;  %p113_p10 = scmp.eq.s32.totalorder %s591_s16, 1 }
  0x10   : > { %p877_p9 = por %p107_p6, %p49_p1  ;;  %p1223_p12 = scmp.ge.s32.totalorder %s793_s14, 2 }
  0x11   : > { %s882_s23 = scalar_select %p40_p7, %s781_s11, %s42_s18  }
  0x12   : > { %p884_p11 = por %p113_p10, %p55_p3  ;;  %129 = sbr.rel (%p1223_p12) target bundleno = 64 (0x40), region = 16 }
  0x14   : > { %s1227_s24 = scalar_select %p884_p11, 1, 0 }
  0x19   : > { %s892_s25 = sand.u32 1, %s781_s11   ;;  %s613_s26 = smul.u32 3072, %s789_s13 }
  0x1a   : > { %s612_s27 = smul.u32 384, %s892_s25  ;;  %s795_s28 = smov 6144  }
  0x1b   : > { %620 = sst [smem:[#allocation9]] (%p867_p4), %s795_s28  ;;  %s147_s4 = scalar_lea.hbm %s1220_s0, %s613_s26 }
  0x1c   : > { %s619_s29 = scalar_select %p867_p4, [#allocation0], [#allocation12] }
  0x1d   : > { %s137_s6 = scalar_lea.vmem [#allocation2], %s612_s27  ;;  %s796_s8 = smov 3072  }
  0x1e   : > { %s152_s5 = sld [smem:[%s619_s29]]   ;;  %s160_s7 = sshll.u32 %s137_s6, 4  ;;  %s161_s7 = int_to_ptr.vmem [resolvable:$true] %s160_s7 }
  0x1f   : > { %621 = sst [smem:[#allocation9 + $0x1]] (%p867_p4), %s796_s8  ;;  %s797_s15 = smov 8  }
  0x20   : > { %622 = sst [smem:[#allocation9 + $0x2]] (%p867_p4), %s797_s15  ;;  %s798_s16 = smov 384  }
  0x21   : > { %623 = sst [smem:[#allocation9 + $0x3]] (%p867_p4), %s798_s16  ;;  %s799_s18 = smov 24  }
  0x22   : > { %624 = sst [smem:[#allocation9 + $0x4]] (%p867_p4), %s798_s16  ;;  %s134_s27 = scalar_lea.sflag [#allocation3], %s892_s25 }
  0x23   : > { %625 = sst [smem:[#allocation9 + $0x5]] (%p867_p4), %s799_s18  ;;  %s800_s29 = smov [#allocation8]  }
  0x24   : > { %s597_s20 = sshll.u32 %s152_s5, 26  ;;  %182 = sbr.rel (!%p867_p4) target bundleno = 64 (0x40), region = 24 }
  0x25   : > { %s598_s28 = sadd.s32 134217728, %s597_s20  ;;  %s614_s30 = smul.u32 (%p867_p4), 192, %s892_s25 }
  0x26   : > { %626 = dma.general (%p867_p4), %s147_s4, 6144, %s161_s7, %s134_s27, %s800_s29, [#allocation9], %s598_s28, 0  }
  0x27   : > { %s184_s3 = scalar_lea.sflag (%p867_p4), [#allocation6], %s892_s25  ;;  %s187_s6 = scalar_lea.vmem (%p867_p4), [#allocation5], %s614_s30 }
  0x28   : > { %s923_s16 = scalar_lea.hbm (%p867_p4), %s1221_s1, %s613_s26  ;;  %s202_s5 = sshll.u32 (%p867_p4), %s187_s6, 4  ;;  %s203_s5 = int_to_ptr.vmem [resolvable:$true] %s202_s5 }
  0x29   : > { %s705_s4 = scalar_lea.hbm (%p867_p4), %s923_s16, 3072  ;;  %s709_s18 = scalar_lea.hbm (%p867_p4), %s1221_s1, 240000 }
  0x2a   : > { %p706_p13 = scmp.ne.s32.totalorder (%p867_p4), %s923_s16, %s705_s4  ;;  %p710_p0 = scmp.lt.u32.totalorder (%p867_p4), %s923_s16, %s1221_s1 }
  0x2b   : > { %p711_p1 = scmp.lt.u32.totalorder %s709_s18, %s705_s4  ;;  %p713_p3 = scmp.lt.u32.totalorder %s705_s4, %s923_s16 }
  0x2d   : > { %p712_p2 = por %p711_p1, %p710_p0 }
  0x2f   : > { %p714_p4 = por %p713_p3, %p712_p2 }
  0x31   : > { %p715_p5 = pnand %p714_p4, %p706_p13 }
  0x33   : > { %718 = shalt.err (!%p715_p5)
}
  0x34   : > { %s719_s26 = scalar_lea.vmem %s203_s5, 3072  ;;  %s801_s27 = smov [#allocation5]  }
  0x35   : > { %p720_p6 = scmp.ne.s32.totalorder %s203_s5, %s719_s26  ;;  %s723_s29 = sshll.u32 %s801_s27, 4  ;;  %s724_s29 = int_to_ptr.vmem [resolvable:$false] %s723_s29 }
  0x36   : > { %s725_s30 = scalar_lea.vmem %s724_s29, 6144  ;;  %p726_p7 = scmp.lt.s32.totalorder %s203_s5, %s724_s29 }
  0x37   : > { %p727_p10 = scmp.lt.s32.totalorder %s725_s30, %s719_s26 }
  0x39   : > { %p728_p12 = por %p727_p10, %p726_p7 }
  0x3b   : > { %p729_p11 = pnand %p728_p12, %p720_p6 }
  0x3d   : > { %732 = shalt.err (!%p729_p11)
}
  0x3e   : > { %s802_s6 = smov 384   ;;  %s803_s8 = smov 24  }
  0x3f   : > { %208 = dma.hbm_to_vmem [thread:$0]  %s923_s16, 3072, %s203_s5, %s184_s3, %s802_s6, %s802_s6, %s803_s8  }
  0x40 PF: > { %p606_p13 = scmp.ge.s32.totalorder %s793_s14, 1  ;;  %p210_p0 = scmp.lt.s32.totalorder %s793_s14, 3 }
  0x42   : > { %p211_p1 = pnand %p606_p13, %p210_p0 }
  0x43   : > { %s941_s15 = sand.u32 (!%p211_p1), 1, %s777_s10  }
  0x44   : > { %214 = sbr.rel (%p211_p1) target bundleno = 123 (0x7b), region = 28  ;;  %s217_s19 = scalar_lea.sflag (!%p211_p1), [#allocation3], %s941_s15 }
  0x45   : > { %s616_s4 = smul.u32 (!%p211_p1), 384, %s941_s15 }
  0x47   : > { %s945_s7 = scalar_lea.vmem (!%p211_p1), [#allocation2], %s616_s4 }
  0x4b   : > { %758 = dma.done.wait (%p873_p8), %s217_s19, 6144  }
  0x4c   : > { %760 = vsyncadd (%p873_p8), %s217_s19, 4294961152  ;;  %s617_s25 = smul.u32 192, %s941_s15  ;;  %s226_s3 = scalar_lea.sflag [#allocation6], %s941_s15 }
  0x4e   : > { %s953_s16 = scalar_lea.vmem [#allocation5], %s617_s25 }
  0x4f   : > { %762 = dma.done.wait (%p873_p8), %s226_s3, 3072  }
  0x50   : > { %764 = vsyncadd (%p873_p8), %s226_s3, 4294964224  ;;  %v265_v0 = vld [vmem:[%s945_s7] sm:$0xff]  ;;  %v266_v2 = vld [vmem:[%s945_s7 + $0x8] sm:$0xff]  ;;  %s979_s21 = scalar_lea.vmem [#allocation7], %s616_s4  ;;  %s434_s5 = scalar_lea.sflag [#allocation4], %s941_s15 }
  0x51   : > { %v961_v1 = vld [vmem:[%s953_s16] sm:$0xff]  ;;  %v966_v4 = vld [vmem:[%s953_s16 + $0x8] sm:$0xff]  ;;  %v267_v5 = vld [vmem:[%s945_s7 + $0x10] sm:$0xff] }
  0x52   : > { %v337_v3 = vadd.f32 %v961_v1, %v265_v0  ;;  %v970_v6 = vld [vmem:[%s953_s16 + $0x10] sm:$0xff]  ;;  %v338_v7 = vadd.f32 %v966_v4, %v266_v2  ;;  %v268_v9 = vld [vmem:[%s945_s7 + $0x18] sm:$0xff]  ;;  %v269_v11 = vld [vmem:[%s945_s7 + $0x20] sm:$0xff] }
  0x53   : > { %v339_v8 = vadd.f32 %v970_v6, %v267_v5  ;;  %v976_v10 = vld [vmem:[%s953_s16 + $0x18] sm:$0xff]  ;;  %v984_v13 = vld [vmem:[%s953_s16 + $0x20] sm:$0xff]  ;;  %v270_v14 = vld [vmem:[%s945_s7 + $0x28] sm:$0xff] }
  0x54   : > { %385 = vst [vmem:[%s979_s21] sm:$0xff] %v337_v3  ;;  %v340_v12 = vadd.f32 %v976_v10, %v268_v9  ;;  %v988_v15 = vld [vmem:[%s953_s16 + $0x28] sm:$0xff]  ;;  %386 = vst [vmem:[%s979_s21 + $0x8] sm:$0xff] %v338_v7  ;;  %v341_v16 = vadd.f32 %v984_v13, %v269_v11  ;;  %v271_v18 = vld [vmem:[%s945_s7 + $0x30] sm:$0xff] }
  0x55   : > { %387 = vst [vmem:[%s979_s21 + $0x10] sm:$0xff] %v339_v8  ;;  %v342_v17 = vadd.f32 %v988_v15, %v270_v14  ;;  %v996_v19 = vld [vmem:[%s953_s16 + $0x30] sm:$0xff]  ;;  %v272_v20 = vld [vmem:[%s945_s7 + $0x38] sm:$0xff]  ;;  %v273_v23 = vld [vmem:[%s945_s7 + $0x40] sm:$0xff] }
  0x56   : > { %388 = vst [vmem:[%s979_s21 + $0x18] sm:$0xff] %v340_v12  ;;  %v343_v21 = vadd.f32 %v996_v19, %v271_v18  ;;  %v1002_v22 = vld [vmem:[%s953_s16 + $0x38] sm:$0xff]  ;;  %v1006_v24 = vld [vmem:[%s953_s16 + $0x40] sm:$0xff]  ;;  %389 = vst [vmem:[%s979_s21 + $0x20] sm:$0xff] %v341_v16 }
  0x57   : > { %390 = vst [vmem:[%s979_s21 + $0x28] sm:$0xff] %v342_v17  ;;  %v344_v25 = vadd.f32 %v1002_v22, %v272_v20  ;;  %v345_v26 = vadd.f32 %v1006_v24, %v273_v23  ;;  %v274_v27 = vld [vmem:[%s945_s7 + $0x48] sm:$0xff]  ;;  %v275_v29 = vld [vmem:[%s945_s7 + $0x50] sm:$0xff]  ;;  %v276_v32 = vld [vmem:[%s945_s7 + $0x58] sm:$0xff] }
  0x58   : > { %v1014_v28 = vld [vmem:[%s953_s16 + $0x48] sm:$0xff]  ;;  %391 = vst [vmem:[%s979_s21 + $0x30] sm:$0xff] %v343_v21  ;;  %v1020_v31 = vld [vmem:[%s953_s16 + $0x50] sm:$0xff]  ;;  %v1024_v33 = vld [vmem:[%s953_s16 + $0x58] sm:$0xff] }
  0x59   : > { %v346_v30 = vadd.f32 %v1014_v28, %v274_v27  ;;  %392 = vst [vmem:[%s979_s21 + $0x38] sm:$0xff] %v344_v25  ;;  %393 = vst [vmem:[%s979_s21 + $0x40] sm:$0xff] %v345_v26  ;;  %v347_v34 = vadd.f32 %v1020_v31, %v275_v29  ;;  %v348_v35 = vadd.f32 %v1024_v33, %v276_v32  ;;  %v277_v36 = vld [vmem:[%s945_s7 + $0x60] sm:$0xff]  ;;  %v278_v38 = vld [vmem:[%s945_s7 + $0x68] sm:$0xff] }
  0x5a   : > { %v1032_v37 = vld [vmem:[%s953_s16 + $0x60] sm:$0xff]  ;;  %v1038_v40 = vld [vmem:[%s953_s16 + $0x68] sm:$0xff]  ;;  %v279_v41 = vld [vmem:[%s945_s7 + $0x70] sm:$0xff] }
  0x5b   : > { %394 = vst [vmem:[%s979_s21 + $0x48] sm:$0xff] %v346_v30  ;;  %v349_v39 = vadd.f32 %v1032_v37, %v277_v36  ;;  %v1042_v42 = vld [vmem:[%s953_s16 + $0x70] sm:$0xff]  ;;  %395 = vst [vmem:[%s979_s21 + $0x50] sm:$0xff] %v347_v34  ;;  %v350_v43 = vadd.f32 %v1038_v40, %v278_v38  ;;  %v280_v45 = vld [vmem:[%s945_s7 + $0x78] sm:$0xff] }
  0x5c   : > { %396 = vst [vmem:[%s979_s21 + $0x58] sm:$0xff] %v348_v35  ;;  %v351_v44 = vadd.f32 %v1042_v42, %v279_v41  ;;  %v1050_v46 = vld [vmem:[%s953_s16 + $0x78] sm:$0xff]  ;;  %v281_v47 = vld [vmem:[%s945_s7 + $0x80] sm:$0xff]  ;;  %v282_v50 = vld [vmem:[%s945_s7 + $0x88] sm:$0xff] }
  0x5d   : > { %397 = vst [vmem:[%s979_s21 + $0x60] sm:$0xff] %v349_v39  ;;  %v352_v48 = vadd.f32 %v1050_v46, %v280_v45  ;;  %v1056_v49 = vld [vmem:[%s953_s16 + $0x80] sm:$0xff]  ;;  %v1060_v51 = vld [vmem:[%s953_s16 + $0x88] sm:$0xff]  ;;  %398 = vst [vmem:[%s979_s21 + $0x68] sm:$0xff] %v350_v43 }
  0x5e   : > { %399 = vst [vmem:[%s979_s21 + $0x70] sm:$0xff] %v351_v44  ;;  %v353_v52 = vadd.f32 %v1056_v49, %v281_v47  ;;  %v354_v53 = vadd.f32 %v1060_v51, %v282_v50  ;;  %v283_v54 = vld [vmem:[%s945_s7 + $0x90] sm:$0xff]  ;;  %v284_v56 = vld [vmem:[%s945_s7 + $0x98] sm:$0xff]  ;;  %v285_v59 = vld [vmem:[%s945_s7 + $0xa0] sm:$0xff] }
  0x5f   : > { %v1068_v55 = vld [vmem:[%s953_s16 + $0x90] sm:$0xff]  ;;  %400 = vst [vmem:[%s979_s21 + $0x78] sm:$0xff] %v352_v48  ;;  %v1074_v58 = vld [vmem:[%s953_s16 + $0x98] sm:$0xff]  ;;  %v1078_v60 = vld [vmem:[%s953_s16 + $0xa0] sm:$0xff] }
  0x60   : > { %v355_v57 = vadd.f32 %v1068_v55, %v283_v54  ;;  %401 = vst [vmem:[%s979_s21 + $0x80] sm:$0xff] %v353_v52  ;;  %402 = vst [vmem:[%s979_s21 + $0x88] sm:$0xff] %v354_v53  ;;  %v356_v61 = vadd.f32 %v1074_v58, %v284_v56  ;;  %v357_v62 = vadd.f32 %v1078_v60, %v285_v59  ;;  %v286_v63 = vld [vmem:[%s945_s7 + $0xa8] sm:$0xff]  ;;  %v287_v2 = vld [vmem:[%s945_s7 + $0xb0] sm:$0xff] }
  0x61   : > { %v1086_v0 = vld [vmem:[%s953_s16 + $0xa8] sm:$0xff]  ;;  %v1092_v5 = vld [vmem:[%s953_s16 + $0xb0] sm:$0xff]  ;;  %v288_v7 = vld [vmem:[%s945_s7 + $0xb8] sm:$0xff] }
  0x62   : > { %403 = vst [vmem:[%s979_s21 + $0x90] sm:$0xff] %v355_v57  ;;  %v358_v3 = vadd.f32 %v1086_v0, %v286_v63  ;;  %v1096_v8 = vld [vmem:[%s953_s16 + $0xb8] sm:$0xff]  ;;  %404 = vst [vmem:[%s979_s21 + $0x98] sm:$0xff] %v356_v61  ;;  %v359_v9 = vadd.f32 %v1092_v5, %v287_v2  ;;  %v289_v12 = vld [vmem:[%s945_s7 + $0xc0] sm:$0xff] }
  0x63   : > { %405 = vst [vmem:[%s979_s21 + $0xa0] sm:$0xff] %v357_v62  ;;  %v360_v11 = vadd.f32 %v1096_v8, %v288_v7  ;;  %v290_v14 = vld [vmem:[%s945_s7 + $0xc8] sm:$0xff]  ;;  %v291_v16 = vld [vmem:[%s945_s7 + $0xd0] sm:$0xff]  ;;  %v361_v17 = vadd.f32 %v961_v1, %v289_v12  ;;  %v292_v21 = vld [vmem:[%s945_s7 + $0xd8] sm:$0xff] }
  0x64   : > { %406 = vst [vmem:[%s979_s21 + $0xa8] sm:$0xff] %v358_v3  ;;  %v362_v18 = vadd.f32 %v966_v4, %v290_v14  ;;  %v363_v20 = vadd.f32 %v970_v6, %v291_v16  ;;  %v293_v23 = vld [vmem:[%s945_s7 + $0xe0] sm:$0xff]  ;;  %v294_v25 = vld [vmem:[%s945_s7 + $0xe8] sm:$0xff]  ;;  %407 = vst [vmem:[%s979_s21 + $0xb0] sm:$0xff] %v359_v9  ;;  %v364_v26 = vadd.f32 %v976_v10, %v292_v21 }
  0x65   : > { %408 = vst [vmem:[%s979_s21 + $0xb8] sm:$0xff] %v360_v11  ;;  %v365_v27 = vadd.f32 %v984_v13, %v293_v23  ;;  %v366_v1 = vadd.f32 %v988_v15, %v294_v25  ;;  %v295_v4 = vld [vmem:[%s945_s7 + $0xf0] sm:$0xff]  ;;  %v296_v29 = vld [vmem:[%s945_s7 + $0xf8] sm:$0xff]  ;;  %v297_v6 = vld [vmem:[%s945_s7 + $0x100] sm:$0xff] }
  0x66   : > { %409 = vst [vmem:[%s979_s21 + $0xc0] sm:$0xff] %v361_v17  ;;  %410 = vst [vmem:[%s979_s21 + $0xc8] sm:$0xff] %v362_v18  ;;  %v367_v30 = vadd.f32 %v996_v19, %v295_v4  ;;  %v368_v10 = vadd.f32 %v1002_v22, %v296_v29  ;;  %v369_v13 = vadd.f32 %v1006_v24, %v297_v6  ;;  %v298_v32 = vld [vmem:[%s945_s7 + $0x108] sm:$0xff]  ;;  %v299_v15 = vld [vmem:[%s945_s7 + $0x110] sm:$0xff] }
  0x67   : > { %411 = vst [vmem:[%s979_s21 + $0xd0] sm:$0xff] %v363_v20  ;;  %v300_v34 = vld [vmem:[%s945_s7 + $0x118] sm:$0xff]  ;;  %412 = vst [vmem:[%s979_s21 + $0xd8] sm:$0xff] %v364_v26  ;;  %v370_v35 = vadd.f32 %v1014_v28, %v298_v32  ;;  %v371_v19 = vadd.f32 %v1020_v31, %v299_v15  ;;  %v301_v36 = vld [vmem:[%s945_s7 + $0x120] sm:$0xff] }
  0x68   : > { %413 = vst [vmem:[%s979_s21 + $0xe0] sm:$0xff] %v365_v27  ;;  %414 = vst [vmem:[%s979_s21 + $0xe8] sm:$0xff] %v366_v1  ;;  %v372_v22 = vadd.f32 %v1024_v33, %v300_v34  ;;  %v302_v24 = vld [vmem:[%s945_s7 + $0x128] sm:$0xff]  ;;  %v303_v38 = vld [vmem:[%s945_s7 + $0x130] sm:$0xff]  ;;  %v373_v39 = vadd.f32 %v1032_v37, %v301_v36 }
  0x69   : > { %415 = vst [vmem:[%s979_s21 + $0xf0] sm:$0xff] %v367_v30  ;;  %416 = vst [vmem:[%s979_s21 + $0xf8] sm:$0xff] %v368_v10  ;;  %v374_v28 = vadd.f32 %v1038_v40, %v302_v24  ;;  %v375_v31 = vadd.f32 %v1042_v42, %v303_v38  ;;  %v304_v41 = vld [vmem:[%s945_s7 + $0x138] sm:$0xff]  ;;  %v305_v33 = vld [vmem:[%s945_s7 + $0x140] sm:$0xff] }
  0x6a   : > { %417 = vst [vmem:[%s979_s21 + $0x100] sm:$0xff] %v369_v13  ;;  %v306_v43 = vld [vmem:[%s945_s7 + $0x148] sm:$0xff]  ;;  %418 = vst [vmem:[%s979_s21 + $0x108] sm:$0xff] %v370_v35  ;;  %v376_v44 = vadd.f32 %v1050_v46, %v304_v41  ;;  %v377_v37 = vadd.f32 %v1056_v49, %v305_v33  ;;  %v307_v45 = vld [vmem:[%s945_s7 + $0x150] sm:$0xff] }
  0x6b   : > { %419 = vst [vmem:[%s979_s21 + $0x110] sm:$0xff] %v371_v19  ;;  %420 = vst [vmem:[%s979_s21 + $0x118] sm:$0xff] %v372_v22  ;;  %v378_v40 = vadd.f32 %v1060_v51, %v306_v43  ;;  %v308_v42 = vld [vmem:[%s945_s7 + $0x158] sm:$0xff]  ;;  %v309_v47 = vld [vmem:[%s945_s7 + $0x160] sm:$0xff]  ;;  %v379_v48 = vadd.f32 %v1068_v55, %v307_v45 }
  0x6c   : > { %421 = vst [vmem:[%s979_s21 + $0x120] sm:$0xff] %v373_v39  ;;  %422 = vst [vmem:[%s979_s21 + $0x128] sm:$0xff] %v374_v28  ;;  %v380_v46 = vadd.f32 %v1074_v58, %v308_v42  ;;  %v381_v49 = vadd.f32 %v1078_v60, %v309_v47  ;;  %v310_v50 = vld [vmem:[%s945_s7 + $0x168] sm:$0xff]  ;;  %v311_v51 = vld [vmem:[%s945_s7 + $0x170] sm:$0xff] }
  0x6d   : > { %423 = vst [vmem:[%s979_s21 + $0x130] sm:$0xff] %v375_v31  ;;  %v312_v52 = vld [vmem:[%s945_s7 + $0x178] sm:$0xff]  ;;  %424 = vst [vmem:[%s979_s21 + $0x138] sm:$0xff] %v376_v44  ;;  %v382_v53 = vadd.f32 %v1086_v0, %v310_v50  ;;  %v383_v54 = vadd.f32 %v1092_v5, %v311_v51 }
  0x6e   : > { %425 = vst [vmem:[%s979_s21 + $0x140] sm:$0xff] %v377_v37  ;;  %426 = vst [vmem:[%s979_s21 + $0x148] sm:$0xff] %v378_v40  ;;  %v384_v56 = vadd.f32 %v1096_v8, %v312_v52 }
  0x6f   : > { %427 = vst [vmem:[%s979_s21 + $0x150] sm:$0xff] %v379_v48  ;;  %428 = vst [vmem:[%s979_s21 + $0x158] sm:$0xff] %v380_v46 }
  0x70   : > { %429 = vst [vmem:[%s979_s21 + $0x160] sm:$0xff] %v381_v49  ;;  %430 = vst [vmem:[%s979_s21 + $0x168] sm:$0xff] %v382_v53 }
  0x71   : > { %431 = vst [vmem:[%s979_s21 + $0x170] sm:$0xff] %v383_v54  ;;  %432 = vst [vmem:[%s979_s21 + $0x178] sm:$0xff] %v384_v56 }
  0x72   : > { %s618_s18 = smul.u32 3072, %s785_s12  ;;  %s467_s20 = sshll.u32 %s979_s21, 4  ;;  %s468_s20 = int_to_ptr.vmem [resolvable:$true] %s467_s20 }
  0x73   : > { %s804_s29 = smov 3072   ;;  %s805_s30 = smov 6144  }
  0x74   : > { %s450_s27 = scalar_lea.hbm %s1222_s2, %s618_s18  ;;  %629 = sst [smem:[#allocation11]] (%p877_p9), %s804_s29 }
  0x75   : > { %630 = sst [smem:[#allocation11 + $0x1]] (%p877_p9), %s805_s30  ;;  %s806_s6 = smov 8  }
  0x76   : > { %631 = sst [smem:[#allocation11 + $0x2]] (%p877_p9), %s806_s6  ;;  %s807_s8 = smov 384  }
  0x77   : > { %632 = sst [smem:[#allocation11 + $0x3]] (%p877_p9), %s807_s8  ;;  %s808_s12 = smov 24  }
  0x78   : > { %633 = sst [smem:[#allocation11 + $0x4]] (%p877_p9), %s807_s8  ;;  %s809_s15 = smov [#allocation10]  }
  0x79   : > { %634 = sst [smem:[#allocation11 + $0x5]] (%p877_p9), %s808_s12  ;;  %s810_s4 = smov 0  }
  0x7a   : > { %635 = dma.general (%p877_p9), %s468_s20, 6144, %s450_s27, %s434_s5, %s809_s15, [#allocation11], %s810_s4, 0  }
  0x7b PF: > { %s495_s19 = sand.u32 1, %s773_s9   ;;  %p1228_p8 = scmp.ne.s32.totalorder %s1227_s24, 0 }
  0x7c   : > { %p1229_p11 = scmp.ge.s32.totalorder %s793_s14, 2  ;;  %s496_s7 = scalar_lea.sflag [#allocation4], %s495_s19 }
  0x7e   : > { %p638_p12 = pnand %p1229_p11, %p1228_p8 }
  0x80   : > { %766 = dma.done.wait (!%p638_p12), %s496_s7, 6144  }
  0x81   : > { %768 = vsyncadd (!%p638_p12), %s496_s7, 4294961152  ;;  %s21_s14 = sadd.s32 1, %s793_s14   ;;  %s1230_s9 = smov %s777_s10 }
  0x82   : > { %p18_p2 = scmp.ge.s32.totalorder %s21_s14, 4   ;;  %s1231_s10 = smov %s781_s11 }
  0x83   : > { %s1232_s11 = smov %s882_s23  ;;  %s1233_s12 = smov %s789_s13 }
  0x84   : > { %s1234_s13 = smov %s1236_s17  ;;  %20 = sbr.rel (!%p18_p2) target bundleno = 8 (0x8), region = 96 }
  0x8b   :  { %501 = vsyncpa [#allocation3], 1 }
  0x8c   :  { %503 = vsyncpa [#allocation3 + $0x1], 1 }
  0x8d   :  { %504 = vsyncpa [#allocation6], 1 }
  0x8e   :  { %506 = vsyncpa [#allocation6 + $0x1], 1 }
  0x8f   :  { %507 = vsyncpa [#allocation4], 1 }
  0x90   :  { %509 = vsyncpa [#allocation4 + $0x1], 1 }

</bundles_post_ra>
